<compile_context>
chip_gen: v7x
topology: tpu7x:2x2x1
jax: 0.10.0
libtpu: 0.0.40
codegen_flags: <defaults>
</compile_context>

<pallas_src>
import functools

import jax
import jax.numpy as jnp
from jax.experimental import pallas as pl
from jax.experimental.pallas import tpu as pltpu


def _cdiv(a, b):
    return (a + b - 1) // b


def _round_up(a, m):
    return ((a + m - 1) // m) * m


def _num_tensorcores():
    """Best-effort TensorCores per device: 2 on v7x/megacore, 1 on v5e/v6e."""
    try:
        kind = jax.devices()[0].device_kind.lower()
    except Exception:
        return 1
    if "lite" in kind or "v5e" in kind or "v6" in kind:
        return 1                                   # v5e / v6e: single TC
    if any(tag in kind for tag in ("v7", "v5p", "v4")):
        return 2                                   # megacore / v7x: 2 TCs
    return 1                                       # unknown -> safe default


def _vmem_limit_bytes(multi_tc):
    """Scoped-VMEM limit: 3/4 of capacity, clamped per-TC on multi-TC chips."""
    cap = None
    try:
        cap = int(getattr(pltpu.get_tpu_info(), "vmem_capacity_bytes", 0)) or None
    except Exception:
        cap = None
    if cap is None:
        cap = 64 * 1024 * 1024                     # safe lower bound everywhere
    if multi_tc:
        # get_tpu_info may report chip-level VMEM; v7x has 64 MiB per TC.
        cap = min(cap, 64 * 1024 * 1024)
    return (cap * 3) // 4


def _pick_tile_b(B, C, itemsize, vmem_limit_bytes):
    """Largest 8-aligned batch tile fitting a conservative VMEM budget.

    Byte-based target (no fixed row cap): multi-MiB preds blocks make the
    per-step grid overhead negligible vs. HBM time on all generations.
    """
    fixed = C * 128 * 4 + C * 4                    # resident ones RHS + class row
    budget = max(vmem_limit_bytes // 2 - fixed, 1 << 20)
    per_row = (C * (2 * itemsize + 4 * 4)          # preds double-buffered + ~4 f32 temps
               + 2 * 128 * 4                       # two (row, 128) f32 MXU outputs
               + 6 * 128 * 4)                      # lane-padded (row, 1) f32 columns
    tile_b = budget // per_row
    tile_b = min(tile_b, _round_up(B, 8))
    return max(8, (tile_b // 8) * 8)


def _lsce_kernel(cls_ref, ones_ref, target_ref, preds_ref, out_ref, *,
                 batch, n_classes, epsilon, tile_b, tiles_per_part,
                 total_tiles, has_padding):
    part = pl.program_id(0)        # "parallel": sharded across TensorCores
    i = pl.program_id(1)           # "arbitrary": reduction over batch tiles

    @pl.when(i == 0)
    def _init():
        out_ref[...] = jnp.zeros_like(out_ref)

    t = part * tiles_per_part + i  # global batch-tile index

    def _compute():
        x = preds_ref[...].astype(jnp.float32)          # (tile_b, C)
        ones = ones_ref[...]                            # (C, 128) f32

        # Plain lane reductions on the otherwise idle MXU; all 128 result
        # columns are identical, keep column 0.  HIGHEST => f32-faithful.
        sum_x = jnp.dot(x, ones, preferred_element_type=jnp.float32,
                        precision=jax.lax.Precision.HIGHEST)[:, 0:1]
        m = jnp.max(x, axis=-1, keepdims=True)          # (tile_b, 1)
        p = jnp.exp(x - m)
        sum_exp = jnp.dot(p, ones, preferred_element_type=jnp.float32,
                          precision=jax.lax.Precision.HIGHEST)[:, 0:1]
        lse = jnp.log(sum_exp) + m                      # (tile_b, 1)

        # Target gather: select-sum against the resident class-index row
        # (iota hoisted out of the per-step body).
        tgt = target_ref[...]                           # (tile_b, 1) int32
        x_tgt = jnp.sum(jnp.where(cls_ref[...] == tgt, x, 0.0),
                        axis=-1, keepdims=True)

        #   (eps/C)*(C*lse - sum_x) + (1-2eps)*(lse - x_tgt)
        # = (1-eps)*lse - (eps/C)*sum_x - (1-2eps)*x_tgt
        combined = ((1.0 - epsilon) * lse
                    - (epsilon / n_classes) * sum_x
                    - (1.0 - 2.0 * epsilon) * x_tgt)    # (tile_b, 1)

        if batch % tile_b != 0:
            # Select-based mask (NaN-safe vs. garbage rows of the padded
            # remainder block); only emitted when a partial tile exists and
            # only touches (tile_b, 1) lane-0 data.
            row = t * tile_b + jax.lax.broadcasted_iota(
                jnp.int32, (tile_b, 1), 0)
            combined = jnp.where(row < batch, combined, 0.0)

        # Per-tile scalar, broadcast-accumulated into the tiny resident
        # (8, 128) per-part output block.
        out_ref[...] += jnp.sum(combined, axis=0, keepdims=True)

    if has_padding:
        # Padded steps clamp to the last real tile in the index map (same
        # block index as the previous step => no redundant DMA); skip compute.
        pl.when(t < total_tiles)(_compute)
    else:
        _compute()


def label_smoothing_cross_entropy(preds, target, *, epsilon=0.1,
                                  reduction="mean", tile_b=None,
                                  num_parts=None):
    """preds: (B, C) float (f32 or bf16), target: (B,) int. Scalar f32 loss."""
    B, C = preds.shape

    if num_parts is None:
        num_parts = _num_tensorcores()
    multi_tc = num_parts > 1
    vmem_limit = _vmem_limit_bytes(multi_tc)

    if tile_b is None:
        tile_b = _pick_tile_b(B, C, jnp.dtype(preds.dtype).itemsize, vmem_limit)
    assert tile_b % 8 == 0, "tile_b must be a multiple of 8"

    total_tiles = _cdiv(B, tile_b)
    num_parts = max(1, min(num_parts, total_tiles))
    tiles_per_part = _cdiv(total_tiles, num_parts)
    has_padding = num_parts * tiles_per_part > total_tiles
    last_tile = total_tiles - 1

    target2d = target.astype(jnp.int32).reshape(B, 1)
    cls_idx = jnp.arange(C, dtype=jnp.int32).reshape(1, C)
    ones_rhs = jnp.ones((C, 128), dtype=jnp.float32)

    kernel = functools.partial(
        _lsce_kernel, batch=B, n_classes=C, epsilon=float(epsilon),
        tile_b=tile_b, tiles_per_part=tiles_per_part,
        total_tiles=total_tiles, has_padding=has_padding)

    def _tile_map(p, i):
        # Clamp padded grid steps to the last real tile; their compute is
        # skipped in-kernel and the unchanged block index avoids a re-DMA.
        return (jnp.minimum(p * tiles_per_part + i, last_tile), 0)

    partials = pl.pallas_call(
        kernel,
        out_shape=jax.ShapeDtypeStruct((num_parts * 8, 128), jnp.float32),
        grid_spec=pltpu.PrefetchScalarGridSpec(
            num_scalar_prefetch=0,
            grid=(num_parts, tiles_per_part),
            in_specs=[
                pl.BlockSpec((1, C), lambda p, i: (0, 0)),     # class indices
                pl.BlockSpec((C, 128), lambda p, i: (0, 0)),   # ones RHS (MXU)
                pl.BlockSpec((tile_b, 1), _tile_map),          # target
                pl.BlockSpec((tile_b, C), _tile_map),          # preds (logits)
            ],
            out_specs=pl.BlockSpec((8, 128), lambda p, i: (p, 0)),
        ),
        compiler_params=pltpu.CompilerParams(
            dimension_semantics=("parallel", "arbitrary"),
            vmem_limit_bytes=int(vmem_limit),
        ),
    )(cls_idx, ones_rhs, target2d, preds)

    # Every element of a part's (8, 128) block holds that part's total.
    total = jnp.sum(partials.reshape(num_parts, 8, 128)[:, 0, 0])
    if reduction == "mean":
        return total / jnp.float32(B)
    if reduction == "sum":
        return total
    # TODO(synk): reduction='none' (unreduced per-sample loss) would need a
    # per-row output layout; not wired through this scalar-accumulator kernel.
    raise NotImplementedError("reduction must be 'mean' or 'sum'")


def _reference(preds, target, epsilon=0.1):
    log_p = jax.nn.log_softmax(preds.astype(jnp.float32), axis=-1)
    n = preds.shape[-1]
    loss = jnp.mean(-jnp.sum(log_p, axis=-1))
    nll = jnp.mean(-jnp.take_along_axis(log_p, target[:, None], axis=-1)[:, 0])
    return epsilon * (loss / n) + (1.0 - 2.0 * epsilon) * nll


if __name__ == "__main__":
    key = jax.random.PRNGKey(0)
    k1, k2, k3, k4, k5, k6 = jax.random.split(key, 6)

    # Case 1: small lane-dense shape, single tile, auto tile/parts.
    B1, C1 = 16, 128
    preds1 = jax.random.normal(k1, (B1, C1), dtype=jnp.float32)
    tgt1 = jax.random.randint(k2, (B1,), 0, C1, dtype=jnp.int32)
    out1 = jax.block_until_ready(
        label_smoothing_cross_entropy(preds1, tgt1, epsilon=0.1))
    ref1 = _reference(preds1, tgt1, epsilon=0.1)
    assert jnp.allclose(out1, ref1, rtol=1e-4, atol=1e-4), (out1, ref1)

    # Case 2: forced 2-part split, odd tile count (one padded/skipped step),
    # and batch-remainder masking.
    B2, C2 = 20, 256
    preds2 = jax.random.normal(k3, (B2, C2), dtype=jnp.float32)
    tgt2 = jax.random.randint(k4, (B2,), 0, C2, dtype=jnp.int32)
    out2 = jax.block_until_ready(
        label_smoothing_cross_entropy(preds2, tgt2, epsilon=0.1,
                                      tile_b=8, num_parts=2))
    ref2 = _reference(preds2, tgt2, epsilon=0.1)
    assert jnp.allclose(out2, ref2, rtol=1e-4, atol=1e-4), (out2, ref2)

    # Case 3: bf16 logits ingest (kernel upcasts internally).
    B3, C3 = 32, 128
    preds3 = jax.random.normal(k5, (B3, C3), dtype=jnp.float32).astype(jnp.bfloat16)
    tgt3 = jax.random.randint(k6, (B3,), 0, C3, dtype=jnp.int32)
    out3 = jax.block_until_ready(
        label_smoothing_cross_entropy(preds3, tgt3, epsilon=0.1))
    ref3 = _reference(preds3, tgt3, epsilon=0.1)
    assert jnp.allclose(out3, ref3, rtol=1e-4, atol=1e-4), (out3, ref3)

    print("KERNEL_OK")
</pallas_src>

<mosaic_0001>
module attributes {stable_mosaic.version = 11 : i64} {
  func.func @_lsce_kernel(%arg0: i32, %arg1: i32, %arg2: memref<1x128xi32, #tpu.memory_space<vmem>>, %arg3: memref<128x128xf32, #tpu.memory_space<vmem>>, %arg4: memref<16x1xi32, #tpu.memory_space<vmem>>, %arg5: memref<16x128xf32, #tpu.memory_space<vmem>>, %arg6: memref<8x128xf32, #tpu.memory_space<vmem>>) attributes {dimension_semantics = [#tpu.dimension_semantics<parallel>, #tpu.dimension_semantics<arbitrary>], iteration_bounds = array<i64: 1, 1>, scalar_prefetch = 0 : i64, scratch_operands = 0 : i64, tpu.core_type = #tpu.core_type<tc>, window_params = [{pipeline_mode = #tpu.pipeline_mode<synchronous>, transform_indices = @transform_0, window_bounds = array<i64: 1, 128>}, {pipeline_mode = #tpu.pipeline_mode<synchronous>, transform_indices = @transform_1, window_bounds = array<i64: 128, 128>}, {transform_indices = @transform_2, window_bounds = array<i64: 16, 1>}, {transform_indices = @transform_3, window_bounds = array<i64: 16, 128>}, {transform_indices = @transform_4, window_bounds = array<i64: 8, 128>}]} {
    %c0_i32 = arith.constant 0 : i32
    %0 = arith.cmpi eq, %arg1, %c0_i32 : i32
    %1 = arith.extui %0 : i1 to i32
    %c0_i32_0 = arith.constant 0 : i32
    %2 = arith.cmpi ne, %1, %c0_i32_0 : i32
    scf.if %2 {
      %cst_20 = arith.constant 0.000000e+00 : f32
      %39 = vector.broadcast %cst_20 : f32 to vector<8x128xf32>
      %c0_21 = arith.constant 0 : index
      %c0_22 = arith.constant 0 : index
      %40 = vector.load %arg6[%c0_21, %c0_22] : memref<8x128xf32, #tpu.memory_space<vmem>>, vector<8x128xf32>
      tpu.vector_store %arg6[%c0_21, %c0_22], %39 {strides = array<i32>} : memref<8x128xf32, #tpu.memory_space<vmem>>, vector<8x128xf32>,
    } else {
    }
    %c0 = arith.constant 0 : index
    %c0_1 = arith.constant 0 : index
    %3 = vector.load %arg5[%c0, %c0_1] : memref<16x128xf32, #tpu.memory_space<vmem>>, vector<16x128xf32>
    %c0_2 = arith.constant 0 : index
    %c0_3 = arith.constant 0 : index
    %4 = vector.load %arg3[%c0_2, %c0_3] : memref<128x128xf32, #tpu.memory_space<vmem>>, vector<128x128xf32>
    %cst = arith.constant dense<0.000000e+00> : vector<16x128xf32>
    %5 = tpu.matmul %3, %4, %cst {dimension_numbers = #tpu.dot_dimension_numbers<[1], [0], [0], [1], [0, 0, 1, 1], [], []>, precision = #tpu.contract_precision<fp32>} : vector<16x128xf32>, vector<128x128xf32>, vector<16x128xf32> -> vector<16x128xf32>
    %6 = vector.extract_strided_slice %5 {offsets = [0, 0], sizes = [16, 1], strides = [1, 1]} : vector<16x128xf32> to vector<16x1xf32>
    %cst_4 = arith.constant dense<0xFF800000> : vector<16xf32>
    %7 = vector.multi_reduction <maximumf>, %3, %cst_4 [1] : vector<16x128xf32> to vector<16xf32>
    %8 = vector.shape_cast %7 : vector<16xf32> to vector<16x1xf32>
    %9 = vector.broadcast %8 : vector<16x1xf32> to vector<16x128xf32>
    %10 = arith.subf %3, %9 : vector<16x128xf32>
    %11 = math.exp %10 : vector<16x128xf32>
    %cst_5 = arith.constant dense<0.000000e+00> : vector<16x128xf32>
    %12 = tpu.matmul %11, %4, %cst_5 {dimension_numbers = #tpu.dot_dimension_numbers<[1], [0], [0], [1], [0, 0, 1, 1], [], []>, precision = #tpu.contract_precision<fp32>} : vector<16x128xf32>, vector<128x128xf32>, vector<16x128xf32> -> vector<16x128xf32>
    %13 = vector.extract_strided_slice %12 {offsets = [0, 0], sizes = [16, 1], strides = [1, 1]} : vector<16x128xf32> to vector<16x1xf32>
    %14 = math.log %13 : vector<16x1xf32>
    %15 = arith.addf %14, %8 : vector<16x1xf32>
    %c0_6 = arith.constant 0 : index
    %c0_7 = arith.constant 0 : index
    %16 = vector.load %arg4[%c0_6, %c0_7] : memref<16x1xi32, #tpu.memory_space<vmem>>, vector<16x1xi32>
    %c0_8 = arith.constant 0 : index
    %c0_9 = arith.constant 0 : index
    %17 = vector.load %arg2[%c0_8, %c0_9] : memref<1x128xi32, #tpu.memory_space<vmem>>, vector<1x128xi32>
    %18 = vector.broadcast %17 : vector<1x128xi32> to vector<16x128xi32>
    %19 = vector.broadcast %16 : vector<16x1xi32> to vector<16x128xi32>
    %20 = arith.cmpi eq, %18, %19 : vector<16x128xi32>
    %cst_10 = arith.constant 0.000000e+00 : f32
    %21 = vector.broadcast %cst_10 : f32 to vector<16x128xf32>
    %22 = arith.select %20, %3, %21 : vector<16x128xi1>, vector<16x128xf32>
    %cst_11 = arith.constant dense<0.000000e+00> : vector<16xf32>
    %23 = vector.multi_reduction <add>, %22, %cst_11 [1] : vector<16x128xf32> to vector<16xf32>
    %24 = vector.shape_cast %23 : vector<16xf32> to vector<16x1xf32>
    %cst_12 = arith.constant 0.899999976 : f32
    %25 = vector.broadcast %cst_12 : f32 to vector<16x1xf32>
    %26 = arith.mulf %25, %15 : vector<16x1xf32>
    %cst_13 = arith.constant 7.812500e-04 : f32
    %27 = vector.broadcast %cst_13 : f32 to vector<16x1xf32>
    %28 = arith.mulf %27, %6 : vector<16x1xf32>
    %29 = arith.subf %26, %28 : vector<16x1xf32>
    %cst_14 = arith.constant 8.000000e-01 : f32
    %30 = vector.broadcast %cst_14 : f32 to vector<16x1xf32>
    %31 = arith.mulf %30, %24 : vector<16x1xf32>
    %32 = arith.subf %29, %31 : vector<16x1xf32>
    %c0_15 = arith.constant 0 : index
    %c0_16 = arith.constant 0 : index
    %33 = vector.load %arg6[%c0_15, %c0_16] : memref<8x128xf32, #tpu.memory_space<vmem>>, vector<8x128xf32>
    %cst_17 = arith.constant dense<0.000000e+00> : vector<1xf32>
    %34 = vector.multi_reduction <add>, %32, %cst_17 [0] : vector<16x1xf32> to vector<1xf32>
    %35 = vector.shape_cast %34 : vector<1xf32> to vector<1x1xf32>
    %36 = vector.broadcast %35 : vector<1x1xf32> to vector<8x128xf32>
    %37 = arith.addf %33, %36 : vector<8x128xf32>
    %c0_18 = arith.constant 0 : index
    %c0_19 = arith.constant 0 : index
    %38 = vector.load %arg6[%c0_18, %c0_19] : memref<8x128xf32, #tpu.memory_space<vmem>>, vector<8x128xf32>
    tpu.vector_store %arg6[%c0_18, %c0_19], %37 {strides = array<i32>} : memref<8x128xf32, #tpu.memory_space<vmem>>, vector<8x128xf32>,
    return
  }
  func.func @transform_0(%arg0: i32, %arg1: i32) -> (i32, i32) {
    %c0_i32 = arith.constant 0 : i32
    %c0_i32_0 = arith.constant 0 : i32
    %c0_i32_1 = arith.constant 0 : i32
    return %c0_i32, %c0_i32_0 : i32, i32
  }
  func.func @transform_1(%arg0: i32, %arg1: i32) -> (i32, i32) {
    %c0_i32 = arith.constant 0 : i32
    %c0_i32_0 = arith.constant 0 : i32
    %c0_i32_1 = arith.constant 0 : i32
    return %c0_i32, %c0_i32_0 : i32, i32
  }
  func.func @transform_2(%arg0: i32, %arg1: i32) -> (i32, i32) {
    %c1_i32 = arith.constant 1 : i32
    %0 = arith.muli %arg0, %c1_i32 : i32
    %1 = arith.addi %0, %arg1 : i32
    %c0_i32 = arith.constant 0 : i32
    %2 = arith.minsi %1, %c0_i32 : i32
    %c0_i32_0 = arith.constant 0 : i32
    %c0_i32_1 = arith.constant 0 : i32
    return %2, %c0_i32_0 : i32, i32
  }
  func.func @transform_3(%arg0: i32, %arg1: i32) -> (i32, i32) {
    %c1_i32 = arith.constant 1 : i32
    %0 = arith.muli %arg0, %c1_i32 : i32
    %1 = arith.addi %0, %arg1 : i32
    %c0_i32 = arith.constant 0 : i32
    %2 = arith.minsi %1, %c0_i32 : i32
    %c0_i32_0 = arith.constant 0 : i32
    %c0_i32_1 = arith.constant 0 : i32
    return %2, %c0_i32_0 : i32, i32
  }
  func.func @transform_4(%arg0: i32, %arg1: i32) -> (i32, i32) {
    %c0_i32 = arith.constant 0 : i32
    %c0_i32_0 = arith.constant 0 : i32
    return %arg0, %c0_i32 : i32, i32
  }
}

</mosaic_0001>

<bundles_post_ra>
// kernel: tpu_custom_call.1
= control target key start
LH: loop header
LB: loop body
LE: loop exit
PB: predicated region body
PF: predicated region fallthrough
CT: control target
= control target key end

     0   :  { %9 = vsyncpa [#allocation3], 0  ;;  %s3195_s0 = inlined_call_operand.vmem [shape: s32[1,128], index: 0, kind: input, shape index: {}]   ;;  %s3196_s1 = inlined_call_operand.hbm [shape: f32[128,128], index: 1, kind: input, shape index: {}]   ;;  %s3197_s2 = inlined_call_operand.vmem [shape: s32[16,1], index: 2, kind: input, shape index: {}]   ;;  %s3198_s3 = inlined_call_operand.vmem [shape: f32[16,128], index: 3, kind: input, shape index: {}]   ;;  %s3199_s4 = inlined_call_operand.hbm [shape: f32[8,128], index: 4, kind: output, shape index: {}]  }
   0x1   :  { %10 = vsyncpa [#allocation4], 0  ;;  %s2684_s15 = smov [#allocation2]   ;;  %s2636_s19 = scalar_lea.hbm %s3196_s1, 2048 }
   0x2   :  { %s18_s16 = sshll.u32 %s2684_s15, 4  ;;  %p2637_p0 = scmp.ne.s32.totalorder %s3196_s1, %s2636_s19  ;;  %s19_s16 = int_to_ptr.vmem [resolvable:$true] %s18_s16 }
   0x3   :  { %p2640_p1 = scmp.lt.u32.totalorder %s2636_s19, %s3196_s1 }
   0x5   :  { %p2642_p2 = pnand %p2640_p1, %p2637_p0 }
   0x7   :  { %2645 = shalt.err (!%p2642_p2)
}
   0x8   :  { %s2646_s24 = scalar_lea.vmem %s19_s16, 2048  ;;  %p2651_p4 = scmp.lt.s32.totalorder %s19_s16, %s19_s16 }
   0x9   :  { %p2647_p3 = scmp.ne.s32.totalorder %s19_s16, %s2646_s24  ;;  %p2652_p5 = scmp.lt.s32.totalorder %s2646_s24, %s2646_s24 }
   0xb   :  { %p2653_p6 = por %p2652_p5, %p2651_p4 }
   0xd   :  { %p2654_p7 = pnand %p2653_p6, %p2647_p3 }
   0xf   :  { %2657 = shalt.err (!%p2654_p7)
}
  0x10   :  { %s2685_s25 = smov 128   ;;  %s2686_s26 = smov 8  }
  0x11   :  { %24 = dma.hbm_to_vmem [thread:$0]  %s3196_s1, 2048, %s19_s16, [#allocation3], %s2685_s25, %s2685_s25, %s2686_s26  }
  0x12   :  { %2680 = dma.done.wait [#allocation3], 2048  }
  0x13   :  { %2681 = vsyncadd [#allocation3], 4294965248  ;;  %v2729_v0 = vld [vmem:[%s3198_s3] sm:$0xff]  ;;  %v104_v2 = vld [vmem:[#allocation2 + $0x8] sm:$0xff]  ;;  %vm1535_vm2 = vcmask 7168  }
  0x14   :  { %v103_v1 = vld [vmem:[#allocation2] sm:$0xff]  ;;  %803 = vmax.xlane.f32.xlu0 %v2729_v0  ;;  %v123_v4 = vand.u32 4294901760, %v104_v2  ;;  %v105_v5 = vld [vmem:[#allocation2 + $0x10] sm:$0xff]  ;;  %v106_v6 = vld [vmem:[#allocation2 + $0x18] sm:$0xff]  ;;  %v2740_v12 = vand.u32 4294901760, %v2729_v0 }
  0x15   :  { %v120_v3 = vand.u32 4294901760, %v103_v1  ;;  %v2735_v7 = vld [vmem:[%s3198_s3 + $0x8] sm:$0xff]  ;;  %v126_v8 = vand.u32 4294901760, %v105_v5  ;;  %v129_v9 = vand.u32 4294901760, %v106_v6  ;;  %v107_v10 = vld [vmem:[#allocation2 + $0x20] sm:$0xff]  ;;  %v2747_v17 = vld [vmem:[#allocation2 + $0x30] sm:$0xff] }
  0x16   :  { %v2737_v11 = vld [vmem:[#allocation2 + $0x28] sm:$0xff]  ;;  %v132_v14 = vand.u32 4294901760, %v107_v10  ;;  %v2749_v18 = vld [vmem:[#allocation2 + $0x38] sm:$0xff]  ;;  %v138_v20 = vand.u32 4294901760, %v2747_v17  ;;  %v2764_v22 = vsub.f32 %v2729_v0, %v2740_v12  ;;  %v111_v23 = vld [vmem:[#allocation2 + $0x40] sm:$0xff]  ;;  %v2770_v26 = vand.u32 4294901760, %v2735_v7 }
  0x17   :  { %v2742_v13 = vpack.c.bf16 %v123_v4, %v120_v3  ;;  %v135_v15 = vand.u32 4294901760, %v2737_v11  ;;  %v2745_v16 = vpack.c.bf16 %v129_v9, %v126_v8  ;;  %v141_v21 = vand.u32 4294901760, %v2749_v18  ;;  %v112_v24 = vld [vmem:[#allocation2 + $0x48] sm:$0xff]  ;;  %v113_v31 = vld [vmem:[#allocation2 + $0x50] sm:$0xff]  ;;  %v114_v32 = vld [vmem:[#allocation2 + $0x58] sm:$0xff] }
  0x18   :  { %805 = vmax.xlane.f32.xlu0 %v2735_v7  ;;  %v202_v25 = vand.u32 4294901760, %v2764_v22  ;;  %v144_v28 = vand.u32 4294901760, %v111_v23  ;;  %v147_v29 = vand.u32 4294901760, %v112_v24  ;;  %v115_v33 = vld [vmem:[#allocation2 + $0x60] sm:$0xff]  ;;  %v116_v34 = vld [vmem:[#allocation2 + $0x68] sm:$0xff]  ;;  %v2785_v36 = vsub.f32 %v103_v1, %v120_v3  ;;  %v117_v38 = vld [vmem:[#allocation2 + $0x70] sm:$0xff] }
  0x19   :  { %2217 = vmatprep.subr.bf16.mxu0 %v2742_v13  ;;  %2409 = vmatprep.subr.bf16.mxu1 %v2742_v13  ;;  %v2758_v19 = vpack.c.bf16 %v135_v15, %v132_v14  ;;  %v2778_v27 = vpack.c.bf16 %v141_v21, %v138_v20  ;;  %v2787_v37 = vsub.f32 %v104_v2, %v123_v4  ;;  %v118_v39 = vld [vmem:[#allocation2 + $0x78] sm:$0xff]  ;;  %v150_v44 = vand.u32 4294901760, %v113_v31 }
  0x1a   :  { %2219 = vmatpush3.bf16.msra.mxu0 %v2742_v13  ;;  %2411 = vmatpush3.bf16.msra.mxu1 %v2742_v13  ;;  %v203_v30 = vsub.f32 %v2764_v22, %v202_v25  ;;  %v2792_v40 = vsub.f32 %v2735_v7, %v2770_v26  ;;  %v2794_v41 = vsub.f32 %v105_v5, %v126_v8  ;;  %v153_v45 = vand.u32 4294901760, %v114_v32 }
  0x1b   :  { %2221 = vmatprep.subr.bf16.mxu0 %v2745_v16  ;;  %2413 = vmatprep.subr.bf16.mxu1 %v2745_v16  ;;  %v2796_v42 = vsub.f32 %v106_v6, %v129_v9  ;;  %v2799_v43 = vpack.c.bf16 %v147_v29, %v144_v28  ;;  %v156_v46 = vand.u32 4294901760, %v115_v33  ;;  %v159_v47 = vand.u32 4294901760, %v116_v34 }
  0x1c   :  { %v204_v35 = vand.u32 4294901760, %v203_v30  ;;  %v162_v48 = vand.u32 4294901760, %v117_v38  ;;  %v165_v49 = vand.u32 4294901760, %v118_v39  ;;  %v223_v50 = vand.u32 4294901760, %v2785_v36 }
  0x1d   :  { %v230_v51 = vand.u32 4294901760, %v2787_v37  ;;  %v212_v52 = vand.u32 4294901760, %v2792_v40  ;;  %v237_v53 = vand.u32 4294901760, %v2794_v41  ;;  %v244_v54 = vand.u32 4294901760, %v2796_v42 }
  0x1e   :  { %2223 = vmatpush3.bf16.msra.mxu0 %v2745_v16  ;;  %2415 = vmatpush3.bf16.msra.mxu1 %v2745_v16  ;;  %v2809_v55 = vsub.f32 %v107_v10, %v132_v14  ;;  %v2812_v56 = vpack.c.bf16 %v153_v45, %v150_v44  ;;  %v2814_v57 = vpack.c.bf16 %v159_v47, %v156_v46 }
  0x1f   :  { %2225 = vmatprep.subr.bf16.mxu0 %v2758_v19  ;;  %2417 = vmatprep.subr.bf16.mxu1 %v2758_v19  ;;  %v2817_v58 = vpack.c.bf16 %v165_v49, %v162_v48  ;;  %v224_v59 = vsub.f32 %v2785_v36, %v223_v50  ;;  %v231_v60 = vsub.f32 %v2787_v37, %v230_v51 }
  0x20   :  { %1828 = vmatprep.mubr.f32.mxu0 %v204_v35  ;;  %v2824_v61 = vsub.f32 %v2737_v11, %v135_v15  ;;  %v213_v62 = vsub.f32 %v2792_v40, %v212_v52  ;;  %v238_v63 = vsub.f32 %v2794_v41, %v237_v53  ;;  %v245_v1 = vsub.f32 %v2796_v42, %v244_v54 }
  0x21   :  { %v251_v2 = vand.u32 4294901760, %v2809_v55  ;;  %v2838_v3 = vsub.f32 %v2747_v17, %v138_v20  ;;  %v2843_v4 = vsub.f32 %v2749_v18, %v141_v21  ;;  %v2845_v5 = vsub.f32 %v111_v23, %v144_v28 }
  0x22   :  { %2227 = vmatpush3.bf16.msra.mxu0 %v2758_v19  ;;  %2419 = vmatpush3.bf16.msra.mxu1 %v2758_v19  ;;  %v2847_v6 = vsub.f32 %v112_v24, %v147_v29  ;;  %v2849_v8 = vsub.f32 %v113_v31, %v150_v44  ;;  %v2851_v9 = vsub.f32 %v114_v32, %v153_v45  ;;  %v225_v14 = vand.u32 4294901760, %v224_v59 }
  0x23   :  { %2229 = vmatprep.subr.bf16.mxu0 %v2778_v27  ;;  %2421 = vmatprep.subr.bf16.mxu1 %v2778_v27  ;;  %v2853_v10 = vsub.f32 %v115_v33, %v156_v46  ;;  %v2855_v11 = vsub.f32 %v116_v34, %v159_v47  ;;  %v258_v15 = vand.u32 4294901760, %v2824_v61  ;;  %v2859_v17 = vsub.f32 %v117_v38, %v162_v48 }
  0x24   :  { %v2861_v18 = vsub.f32 %v118_v39, %v165_v49  ;;  %v232_v20 = vand.u32 4294901760, %v231_v60  ;;  %v239_v21 = vand.u32 4294901760, %v238_v63  ;;  %v246_v23 = vand.u32 4294901760, %v245_v1 }
  0x25   :  { %v252_v24 = vsub.f32 %v2809_v55, %v251_v2  ;;  %v265_v28 = vand.u32 4294901760, %v2838_v3  ;;  %v272_v29 = vand.u32 4294901760, %v2843_v4  ;;  %v279_v30 = vand.u32 4294901760, %v2845_v5 }
  0x26   :  { %2231 = vmatpush3.bf16.msra.mxu0 %v2778_v27  ;;  %2423 = vmatpush3.bf16.msra.mxu1 %v2778_v27  ;;  %v286_v31 = vand.u32 4294901760, %v2847_v6  ;;  %v293_v32 = vand.u32 4294901760, %v2849_v8  ;;  %v300_v33 = vand.u32 4294901760, %v2851_v9  ;;  %v307_v34 = vand.u32 4294901760, %v2853_v10 }
  0x27   :  { %2233 = vmatprep.subr.bf16.mxu0 %v2799_v43  ;;  %2425 = vmatprep.subr.bf16.mxu1 %v2799_v43  ;;  %v314_v35 = vand.u32 4294901760, %v2855_v11  ;;  %v321_v38 = vand.u32 4294901760, %v2859_v17  ;;  %v328_v39 = vand.u32 4294901760, %v2861_v18  ;;  %v2878_v44 = vpack.c.bf16 %v230_v51, %v223_v50 }
  0x28   :  { %v2880_v45 = vpack.c.bf16 %v244_v54, %v237_v53  ;;  %v259_v46 = vsub.f32 %v2824_v61, %v258_v15  ;;  %v2885_v47 = vpack.c.bf16 %v258_v15, %v251_v2  ;;  %v2887_v48 = vpack.c.bf16 %v272_v29, %v265_v28 }
  0x29   :  { %v2889_v49 = vpack.c.bf16 %v286_v31, %v279_v30  ;;  %v2892_v59 = vpack.c.bf16 %v232_v20, %v225_v14  ;;  %v2894_v50 = vpack.c.bf16 %v300_v33, %v293_v32  ;;  %v2896_v51 = vpack.c.bf16 %v314_v35, %v307_v34 }
  0x2a   :  { %2235 = vmatpush3.bf16.msra.mxu0 %v2799_v43  ;;  %2427 = vmatpush3.bf16.msra.mxu1 %v2799_v43  ;;  %v2898_v53 = vpack.c.bf16 %v328_v39, %v321_v38  ;;  %v214_v54 = vand.u32 4294901760, %v213_v62  ;;  %v253_v60 = vand.u32 4294901760, %v252_v24  ;;  %v2904_v63 = vpack.c.bf16 %v246_v23, %v239_v21 }
  0x2b   :  { %2237 = vmatprep.subr.bf16.mxu0 %v2812_v56  ;;  %2429 = vmatprep.subr.bf16.mxu1 %v2812_v56  ;;  %v260_v1 = vand.u32 4294901760, %v259_v46  ;;  %v266_v2 = vsub.f32 %v2838_v3, %v265_v28  ;;  %v273_v14 = vsub.f32 %v2843_v4, %v272_v29  ;;  %v280_v62 = vsub.f32 %v2845_v5, %v279_v30 }
  0x2c   :  { %v287_v23 = vsub.f32 %v2847_v6, %v286_v31  ;;  %v294_v30 = vsub.f32 %v2849_v8, %v293_v32  ;;  %v301_v46 = vsub.f32 %v2851_v9, %v300_v33 }
  0x2d   :  { %v2914_v15 = vpack.c.bf16 %v260_v1, %v253_v60  ;;  %v267_v20 = vand.u32 4294901760, %v266_v2  ;;  %v274_v21 = vand.u32 4294901760, %v273_v14  ;;  %v281_v24 = vand.u32 4294901760, %v280_v62 }
  0x2e   :  { %2239 = vmatpush3.bf16.msra.mxu0 %v2812_v56  ;;  %2431 = vmatpush3.bf16.msra.mxu1 %v2812_v56  ;;  %v288_v29 = vand.u32 4294901760, %v287_v23  ;;  %v295_v31 = vand.u32 4294901760, %v294_v30  ;;  %v302_v1 = vand.u32 4294901760, %v301_v46  ;;  %v315_v2 = vsub.f32 %v2855_v11, %v314_v35 }
  0x2f   :  { %2241 = vmatprep.subr.bf16.mxu0 %v2814_v57  ;;  %2433 = vmatprep.subr.bf16.mxu1 %v2814_v57  ;;  %v2919_v28 = vpack.c.bf16 %v274_v21, %v267_v20  ;;  %v322_v62 = vsub.f32 %v2859_v17, %v321_v38  ;;  %v2947_v38 = vpack.c.bf16 %v2787_v37, %v2785_v36 }
  0x30   :  { %v2926_v60 = vpack.c.bf16 %v288_v29, %v281_v24  ;;  %v2931_v32 = vpack.c.bf16 %v302_v1, %v295_v31  ;;  %v316_v33 = vand.u32 4294901760, %v315_v2  ;;  %v2961_v36 = vpack.c.bf16 %v2824_v61, %v2809_v55 }
  0x31   :  { %v323_v21 = vand.u32 4294901760, %v322_v62  ;;  %v2967_v37 = vpack.c.bf16 %v2843_v4, %v2838_v3  ;;  %v2985_v55 = vpack.c.bf16 %v2855_v11, %v2853_v10  ;;  %v2991_v61 = vpack.c.bf16 %v2861_v18, %v2859_v17 }
  0x32   :  { %2243 = vmatpush3.bf16.msra.mxu0 %v2814_v57  ;;  %2435 = vmatpush3.bf16.msra.mxu1 %v2814_v57 }
  0x33   :  { %2245 = vmatprep.subr.bf16.mxu0 %v2817_v58  ;;  %2437 = vmatprep.subr.bf16.mxu1 %v2817_v58 }
  0x36   :  { %2247 = vmatpush3.bf16.msra.mxu0 %v2817_v58  ;;  %2439 = vmatpush3.bf16.msra.mxu1 %v2817_v58 }
  0x37   :  { %2249 = vmatprep.subr.bf16.mxu0 %v2892_v59  ;;  %2441 = vmatprep.subr.bf16.mxu1 %v2892_v59 }
  0x39   :  { %1829 = vmatmul.mubr.f32.vlgmr.msra.gmra.mrb[0].mxu0 %v214_v54  ;;  %v308_v54 = vsub.f32 %v2853_v10, %v307_v34  ;;  %v329_v34 = vsub.f32 %v2861_v18, %v328_v39  ;;  %v2953_v39 = vpack.c.bf16 %v2796_v42, %v2794_v41  ;;  %v2973_v41 = vpack.c.bf16 %v2847_v6, %v2845_v5  ;;  %v1503_v6 = vld [vmem:[%s3197_s2] sm:$0xff] }
  0x3a   :  { %2251 = vmatpush3.bf16.msra.mxu0 %v2892_v59  ;;  %1863 = vmatprep.mubr.f32.mxu0 %v2740_v12  ;;  %v2979_v42 = vpack.c.bf16 %v2851_v9, %v2849_v8  ;;  %v2687_v5 = vmov 0   ;;  %v1504_v9 = vld [vmem:[%s3197_s2 + $0x8] sm:$0xff] }
  0x3b   :  { %2253 = vmatprep.subr.bf16.mxu0 %v2904_v63  ;;  %v309_v14 = vand.u32 4294901760, %v308_v54  ;;  %v330_v35 = vand.u32 4294901760, %v329_v34  ;;  %2626 = vset.pattern.permute.xlu1 %v2687_v5 }
  0x3c   :  { %2627 = vset.pattern.permute.xlu0 %v2687_v5  ;;  %1511 = vperm.xlu1 %2626, %v1503_v6  }
  0x3d   :  { %v2937_v20 = vpack.c.bf16 %v316_v33, %v309_v14  ;;  %v2941_v23 = vpack.c.bf16 %v330_v35, %v323_v21 }
  0x3e   :  { %2255 = vmatpush3.bf16.msra.mxu0 %v2904_v63 }
  0x3f   :  { %2257 = vmatprep.subr.bf16.mxu0 %v2914_v15 }
  0x40   :  { %1514 = vperm.xlu1 %2626, %v1504_v9  }
  0x42   :  { %2259 = vmatpush3.bf16.msra.mxu0 %v2914_v15 }
  0x43   :  { %2261 = vmatprep.subr.bf16.mxu0 %v2919_v28 }
  0x46   :  { %2263 = vmatpush3.bf16.msra.mxu0 %v2919_v28 }
  0x47   :  { %2265 = vmatprep.subr.bf16.mxu0 %v2926_v60 }
  0x4a   :  { %2267 = vmatpush3.bf16.msra.mxu0 %v2926_v60 }
  0x4b   :  { %2269 = vmatprep.subr.bf16.mxu0 %v2931_v32 }
  0x4e   :  { %2271 = vmatpush3.bf16.msra.mxu0 %v2931_v32 }
  0x4f   :  { %2273 = vmatprep.subr.bf16.mxu0 %v2937_v20 }
  0x52   :  { %2275 = vmatpush3.bf16.msra.mxu0 %v2937_v20 }
  0x53   :  { %2277 = vmatprep.subr.bf16.mxu0 %v2941_v23 }
  0x56   :  { %2279 = vmatpush3.bf16.msra.mxu0 %v2941_v23 }
  0x57   :  { %2281 = vmatprep.subr.bf16.mxu0 %v2947_v38 }
  0x59   :  { %1864 = vmatmul.mubr.f32.vlgmr.msra.gmra.mrb[0].mxu0 %v2770_v26 }
  0x5a   :  { %2283 = vmatpush3.bf16.msra.mxu0 %v2947_v38  ;;  %1898 = vmatprep.mubr.f32.mxu0 %v2764_v22 }
  0x5b   :  { %2285 = vmatprep.subr.bf16.mxu0 %v2953_v39 }
  0x5e   :  { %2287 = vmatpush3.bf16.msra.mxu0 %v2953_v39 }
  0x5f   :  { %2289 = vmatprep.subr.bf16.mxu0 %v2961_v36 }
  0x62   :  { %2291 = vmatpush3.bf16.msra.mxu0 %v2961_v36 }
  0x63   :  { %2293 = vmatprep.subr.bf16.mxu0 %v2967_v37 }
  0x66   :  { %2295 = vmatpush3.bf16.msra.mxu0 %v2967_v37 }
  0x67   :  { %2297 = vmatprep.subr.bf16.mxu0 %v2973_v41 }
  0x6a   :  { %2299 = vmatpush3.bf16.msra.mxu0 %v2973_v41 }
  0x6b   :  { %2301 = vmatprep.subr.bf16.mxu0 %v2979_v42 }
  0x6e   :  { %2303 = vmatpush3.bf16.msra.mxu0 %v2979_v42 }
  0x6f   :  { %2305 = vmatprep.subr.bf16.mxu0 %v2985_v55 }
  0x72   :  { %2307 = vmatpush3.bf16.msra.mxu0 %v2985_v55 }
  0x73   :  { %2309 = vmatprep.subr.bf16.mxu0 %v2991_v61 }
  0x76   :  { %2311 = vmatpush3.bf16.msra.mxu0 %v2991_v61 }
  0x77   :  { %2313 = vmatprep.subr.bf16.mxu0 %v2742_v13 }
  0x79   :  { %1899 = vmatmul.mubr.f32.vlgmr.msra.gmra.mrb[0].mxu0 %v2792_v40 }
  0x7a   :  { %2315 = vmatpush3.bf16.msra.mxu0 %v2742_v13  ;;  %1933 = vmatprep.mubr.f32.mxu0 %v202_v25 }
  0x7b   :  { %2317 = vmatprep.subr.bf16.mxu0 %v2745_v16 }
  0x7e   :  { %2319 = vmatpush3.bf16.msra.mxu0 %v2745_v16 }
  0x7f   :  { %2321 = vmatprep.subr.bf16.mxu0 %v2758_v19 }
  0x82   :  { %2323 = vmatpush3.bf16.msra.mxu0 %v2758_v19 }
  0x83   :  { %2325 = vmatprep.subr.bf16.mxu0 %v2778_v27 }
  0x86   :  { %2327 = vmatpush3.bf16.msra.mxu0 %v2778_v27 }
  0x87   :  { %2329 = vmatprep.subr.bf16.mxu0 %v2799_v43 }
  0x8a   :  { %2331 = vmatpush3.bf16.msra.mxu0 %v2799_v43 }
  0x8b   :  { %2333 = vmatprep.subr.bf16.mxu0 %v2812_v56 }
  0x8e   :  { %2335 = vmatpush3.bf16.msra.mxu0 %v2812_v56 }
  0x8f   :  { %2337 = vmatprep.subr.bf16.mxu0 %v2814_v57 }
  0x92   :  { %2339 = vmatpush3.bf16.msra.mxu0 %v2814_v57 }
  0x93   :  { %2341 = vmatprep.subr.bf16.mxu0 %v2817_v58 }
  0x96   :  { %2343 = vmatpush3.bf16.msra.mxu0 %v2817_v58 }
  0x97   :  { %2345 = vmatprep.subr.bf16.mxu0 %v2878_v44 }
  0x99   :  { %1934 = vmatmul.mubr.f32.vlgmr.msra.gmra.mrb[0].mxu0 %v212_v52 }
  0x9a   :  { %2347 = vmatpush3.bf16.msra.mxu0 %v2878_v44  ;;  %1968 = vmatprep.mubr.f32.mxu0 %v2740_v12 }
  0x9b   :  { %2349 = vmatprep.subr.bf16.mxu0 %v2880_v45 }
  0x9e   :  { %2351 = vmatpush3.bf16.msra.mxu0 %v2880_v45 }
  0x9f   :  { %2353 = vmatprep.subr.bf16.mxu0 %v2885_v47 }
  0xa1   :  { %v3023_v22 = vpop.xlane.xlu0 %803 }
  0xa2   :  { %2355 = vmatpush3.bf16.msra.mxu0 %v2885_v47  ;;  %v807_v25 = vsub.f32 %v2729_v0, %v3023_v22 }
  0xa3   :  { %2357 = vmatprep.subr.bf16.mxu0 %v2887_v48 }
  0xa4   :  { %v809_v40 = vmul.f32 1.442695, %v807_v25 }
  0xa5   :  { %v3029_v52 = vpop.xlane.xlu0 %805 }
  0xa6   :  { %2359 = vmatpush3.bf16.msra.mxu0 %v2887_v48  ;;  %2628 = vpow2.f32 %v809_v40  ;;  %v808_v3 = vsub.f32 %v2735_v7, %v3029_v52 }
  0xa7   :  { %2361 = vmatprep.subr.bf16.mxu0 %v2889_v49 }
  0xa8   :  { %v811_v4 = vmul.f32 1.442695, %v808_v3 }
  0xaa   :  { %2363 = vmatpush3.bf16.msra.mxu0 %v2889_v49  ;;  %2630 = vpow2.f32 %v811_v4 }
  0xab   :  { %2365 = vmatprep.subr.bf16.mxu0 %v2894_v50 }
  0xae   :  { %2367 = vmatpush3.bf16.msra.mxu0 %v2894_v50 }
  0xaf   :  { %2369 = vmatprep.subr.bf16.mxu0 %v2896_v51 }
  0xb0   :  { %v2629_v8 = vpop.eup %2628 }
  0xb1   :  { %v3046_v10 = vand.u32 4294901760, %v2629_v8 }
  0xb2   :  { %2371 = vmatpush3.bf16.msra.mxu0 %v2896_v51 }
  0xb3   :  { %2373 = vmatprep.subr.bf16.mxu0 %v2898_v53  ;;  %v3050_v11 = vsub.f32 %v2629_v8, %v3046_v10 }
  0xb4   :  { %v2631_v17 = vpop.eup %2630 }
  0xb5   :  { %v3052_v18 = vand.u32 4294901760, %v2631_v17  ;;  %v896_v24 = vand.u32 4294901760, %v3050_v11 }
  0xb6   :  { %2375 = vmatpush3.bf16.msra.mxu0 %v2898_v53 }
  0xb7   :  { %2377 = vmatprep.subr.bf16.mxu0 %v2742_v13  ;;  %v897_v29 = vsub.f32 %v3050_v11, %v896_v24  ;;  %v3061_v30 = vsub.f32 %v2631_v17, %v3052_v18 }
  0xb9   :  { %1969 = vmatmul.mubr.f32.vlgmr.msra.gmra.mrb[0].mxu0 %v2770_v26  ;;  %v898_v46 = vand.u32 4294901760, %v897_v29  ;;  %v906_v54 = vand.u32 4294901760, %v3061_v30 }
  0xba   :  { %2379 = vmatpush3.bf16.msra.mxu0 %v2742_v13  ;;  %2003 = vmatprep.mubr.f32.mxu0 %v2740_v12  ;;  %v1579_v12 = vld [vmem:[%s3195_s0] ss:$0 sm:$0xff]  ;;  %s2688_s0 = smov [#allocation5]  }
  0xbb   :  { %2381 = vmatprep.subr.bf16.mxu0 %v2745_v16  ;;  %2038 = vmatprep.mubr.f32.mxu1 %v898_v46  ;;  %v907_v31 = vsub.f32 %v3061_v30, %v906_v54  ;;  %s1558_s10 = sshll.u32 %s2688_s0, 4  ;;  %s1559_s10 = int_to_ptr.vmem [resolvable:$true] %s1558_s10 }
  0xbc   :  { %s2658_s11 = scalar_lea.vmem %s1559_s10, 128  ;;  %p2663_p9 = scmp.lt.s32.totalorder %s1559_s10, %s1559_s10 }
  0xbd   :  { %v908_v1 = vand.u32 4294901760, %v907_v31  ;;  %p2659_p8 = scmp.ne.s32.totalorder %s1559_s10, %s2658_s11  ;;  %p2664_p10 = scmp.lt.s32.totalorder %s2658_s11, %s2658_s11 }
  0xbe   :  { %2383 = vmatpush3.bf16.msra.mxu0 %v2745_v16 }
  0xbf   :  { %2385 = vmatprep.subr.bf16.mxu0 %v2758_v19  ;;  %2039 = vmatmul.mubr.f32.vlgmr.msra.gmra.mrb[0].mxu1 %v908_v1  ;;  %p2665_p11 = por %p2664_p10, %p2663_p9 }
  0xc0   :  { %2443 = vmatpush3.bf16.msra.mxu1 %v2892_v59  ;;  %2073 = vmatprep.mubr.f32.mxu1 %v3046_v10 }
  0xc1   :  { %2445 = vmatprep.subr.bf16.mxu1 %v2904_v63  ;;  %p2666_p12 = pnand %p2665_p11, %p2659_p8 }
  0xc2   :  { %2387 = vmatpush3.bf16.msra.mxu0 %v2758_v19 }
  0xc3   :  { %2389 = vmatprep.subr.bf16.mxu0 %v2778_v27 }
  0xc4   :  { %2447 = vmatpush3.bf16.msra.mxu1 %v2904_v63 }
  0xc5   :  { %2449 = vmatprep.subr.bf16.mxu1 %v2914_v15 }
  0xc6   :  { %2391 = vmatpush3.bf16.msra.mxu0 %v2778_v27 }
  0xc7   :  { %2393 = vmatprep.subr.bf16.mxu0 %v2799_v43 }
  0xc8   :  { %2451 = vmatpush3.bf16.msra.mxu1 %v2914_v15 }
  0xc9   :  { %2453 = vmatprep.subr.bf16.mxu1 %v2919_v28 }
  0xca   :  { %2395 = vmatpush3.bf16.msra.mxu0 %v2799_v43 }
  0xcb   :  { %2397 = vmatprep.subr.bf16.mxu0 %v2812_v56 }
  0xcc   :  { %2455 = vmatpush3.bf16.msra.mxu1 %v2919_v28 }
  0xcd   :  { %2457 = vmatprep.subr.bf16.mxu1 %v2926_v60 }
  0xce   :  { %2399 = vmatpush3.bf16.msra.mxu0 %v2812_v56 }
  0xcf   :  { %2401 = vmatprep.subr.bf16.mxu0 %v2814_v57 }
  0xd0   :  { %2459 = vmatpush3.bf16.msra.mxu1 %v2926_v60 }
  0xd1   :  { %2461 = vmatprep.subr.bf16.mxu1 %v2931_v32 }
  0xd2   :  { %2403 = vmatpush3.bf16.msra.mxu0 %v2814_v57 }
  0xd3   :  { %2405 = vmatprep.subr.bf16.mxu0 %v2817_v58 }
  0xd4   :  { %2463 = vmatpush3.bf16.msra.mxu1 %v2931_v32 }
  0xd5   :  { %2465 = vmatprep.subr.bf16.mxu1 %v2937_v20 }
  0xd6   :  { %2407 = vmatpush3.bf16.msra.mxu0 %v2817_v58 }
  0xd8   :  { %2467 = vmatpush3.bf16.msra.mxu1 %v2937_v20 }
  0xd9   :  { %2004 = vmatmul.mubr.f32.vlgmr.msra.gmra.mrb[0].mxu0 %v2770_v26  ;;  %2469 = vmatprep.subr.bf16.mxu1 %v2941_v23  ;;  %v1512_v26 = vpop.permute.xlu1 %1511 }
  0xda   :  { %vm1516_vm0 = vcmp.eq.s32.totalorder %v1579_v12, %v1512_v26 }
  0xdc   :  { %2471 = vmatpush3.bf16.msra.mxu1 %v2941_v23 }
  0xdd   :  { %2473 = vmatprep.subr.bf16.mxu1 %v2947_v38 }
  0xdf   :  { %2074 = vmatmul.mubr.f32.vlgmr.msra.gmra.mrb[0].mxu1 %v3052_v18 }
  0xe0   :  { %2475 = vmatpush3.bf16.msra.mxu1 %v2947_v38  ;;  %2108 = vmatprep.mubr.f32.mxu1 %v3050_v11 }
  0xe1   :  { %2477 = vmatprep.subr.bf16.mxu1 %v2953_v39 }
  0xe4   :  { %2479 = vmatpush3.bf16.msra.mxu1 %v2953_v39 }
  0xe5   :  { %2481 = vmatprep.subr.bf16.mxu1 %v2961_v36 }
  0xe8   :  { %2483 = vmatpush3.bf16.msra.mxu1 %v2961_v36 }
  0xe9   :  { %2485 = vmatprep.subr.bf16.mxu1 %v2967_v37 }
  0xec   :  { %2487 = vmatpush3.bf16.msra.mxu1 %v2967_v37 }
  0xed   :  { %2489 = vmatprep.subr.bf16.mxu1 %v2973_v41 }
  0xf0   :  { %2491 = vmatpush3.bf16.msra.mxu1 %v2973_v41 }
  0xf1   :  { %2493 = vmatprep.subr.bf16.mxu1 %v2979_v42 }
  0xf4   :  { %2495 = vmatpush3.bf16.msra.mxu1 %v2979_v42 }
  0xf5   :  { %2497 = vmatprep.subr.bf16.mxu1 %v2985_v55 }
  0xf8   :  { %2499 = vmatpush3.bf16.msra.mxu1 %v2985_v55 }
  0xf9   :  { %2501 = vmatprep.subr.bf16.mxu1 %v2991_v61 }
  0xfc   :  { %2503 = vmatpush3.bf16.msra.mxu1 %v2991_v61 }
  0xfd   :  { %2505 = vmatprep.subr.bf16.mxu1 %v2742_v13 }
  0xff   :  { %2109 = vmatmul.mubr.f32.vlgmr.msra.gmra.mrb[0].mxu1 %v3061_v30 }
 0x100   :  { %2507 = vmatpush3.bf16.msra.mxu1 %v2742_v13  ;;  %2143 = vmatprep.mubr.f32.mxu1 %v896_v24 }
 0x101   :  { %2509 = vmatprep.subr.bf16.mxu1 %v2745_v16 }
 0x104   :  { %2511 = vmatpush3.bf16.msra.mxu1 %v2745_v16 }
 0x105   :  { %2513 = vmatprep.subr.bf16.mxu1 %v2758_v19 }
 0x108   :  { %2515 = vmatpush3.bf16.msra.mxu1 %v2758_v19 }
 0x109   :  { %2517 = vmatprep.subr.bf16.mxu1 %v2778_v27 }
 0x10c   :  { %2519 = vmatpush3.bf16.msra.mxu1 %v2778_v27 }
 0x10d   :  { %2521 = vmatprep.subr.bf16.mxu1 %v2799_v43 }
 0x110   :  { %2523 = vmatpush3.bf16.msra.mxu1 %v2799_v43 }
 0x111   :  { %2525 = vmatprep.subr.bf16.mxu1 %v2812_v56 }
 0x114   :  { %2527 = vmatpush3.bf16.msra.mxu1 %v2812_v56 }
 0x115   :  { %2529 = vmatprep.subr.bf16.mxu1 %v2814_v57 }
 0x118   :  { %2531 = vmatpush3.bf16.msra.mxu1 %v2814_v57 }
 0x119   :  { %2533 = vmatprep.subr.bf16.mxu1 %v2817_v58 }
 0x11c   :  { %2535 = vmatpush3.bf16.msra.mxu1 %v2817_v58 }
 0x11d   :  { %2537 = vmatprep.subr.bf16.mxu1 %v2878_v44 }
 0x11f   :  { %2144 = vmatmul.mubr.f32.vlgmr.msra.gmra.mrb[0].mxu1 %v906_v54 }
 0x120   :  { %2539 = vmatpush3.bf16.msra.mxu1 %v2878_v44  ;;  %2178 = vmatprep.mubr.f32.mxu1 %v3046_v10  ;;  %v1518_v44 = vsel %vm1516_vm0, %v2729_v0, 0.0 }
 0x121   :  { %2541 = vmatprep.subr.bf16.mxu1 %v2880_v45  ;;  %1520 = vadd.xlane.f32.xlu0 %v1518_v44 }
 0x124   :  { %2543 = vmatpush3.bf16.msra.mxu1 %v2880_v45  ;;  %v1515_v45 = vpop.permute.xlu1 %1514 }
 0x125   :  { %2545 = vmatprep.subr.bf16.mxu1 %v2885_v47  ;;  %vm1517_vm1 = vcmp.eq.s32.totalorder %v1579_v12, %v1515_v45 }
 0x128   :  { %2547 = vmatpush3.bf16.msra.mxu1 %v2885_v47  ;;  %v1519_v47 = vsel %vm1517_vm1, %v2735_v7, 0.0 }
 0x129   :  { %2549 = vmatprep.subr.bf16.mxu1 %v2887_v48  ;;  %1522 = vadd.xlane.f32.xlu1 %v1519_v47 }
 0x12c   :  { %2551 = vmatpush3.bf16.msra.mxu1 %v2887_v48 }
 0x12d   :  { %2553 = vmatprep.subr.bf16.mxu1 %v2889_v49 }
 0x130   :  { %2555 = vmatpush3.bf16.msra.mxu1 %v2889_v49 }
 0x131   :  { %2557 = vmatprep.subr.bf16.mxu1 %v2894_v50 }
 0x134   :  { %2559 = vmatpush3.bf16.msra.mxu1 %v2894_v50 }
 0x135   :  { %2561 = vmatprep.subr.bf16.mxu1 %v2896_v51 }
 0x138   :  { %2563 = vmatpush3.bf16.msra.mxu1 %v2896_v51 }
 0x139   :  { %2565 = vmatprep.subr.bf16.mxu1 %v2898_v53 }
 0x13c   :  { %2567 = vmatpush3.bf16.msra.mxu1 %v2898_v53 }
 0x13d   :  { %2569 = vmatprep.subr.bf16.mxu1 %v2742_v13 }
 0x13f   :  { %2179 = vmatmul.mubr.f32.vlgmr.msra.gmra.mrb[0].mxu1 %v3052_v18 }
 0x140   :  { %2571 = vmatpush3.bf16.msra.mxu1 %v2742_v13  ;;  %2213 = vmatprep.mubr.f32.mxu1 %v3046_v10 }
 0x141   :  { %2573 = vmatprep.subr.bf16.mxu1 %v2745_v16 }
 0x144   :  { %2575 = vmatpush3.bf16.msra.mxu1 %v2745_v16 }
 0x145   :  { %2577 = vmatprep.subr.bf16.mxu1 %v2758_v19 }
 0x148   :  { %2579 = vmatpush3.bf16.msra.mxu1 %v2758_v19 }
 0x149   :  { %2581 = vmatprep.subr.bf16.mxu1 %v2778_v27 }
 0x14c   :  { %2583 = vmatpush3.bf16.msra.mxu1 %v2778_v27 }
 0x14d   :  { %2585 = vmatprep.subr.bf16.mxu1 %v2799_v43 }
 0x150   :  { %2587 = vmatpush3.bf16.msra.mxu1 %v2799_v43 }
 0x151   :  { %2589 = vmatprep.subr.bf16.mxu1 %v2812_v56 }
 0x154   :  { %2591 = vmatpush3.bf16.msra.mxu1 %v2812_v56 }
 0x155   :  { %2593 = vmatprep.subr.bf16.mxu1 %v2814_v57 }
 0x158   :  { %2595 = vmatpush3.bf16.msra.mxu1 %v2814_v57 }
 0x159   :  { %2597 = vmatprep.subr.bf16.mxu1 %v2817_v58 }
 0x15c   :  { %2599 = vmatpush3.bf16.msra.mxu1 %v2817_v58 }
 0x15f   :  { %2214 = vmatmul.mubr.f32.vlgmr.msra.gmra.mrb[0].mxu1 %v3052_v18 }
 0x1ac   :  { %v2005_v0 = vpop.f32.mrb[0].mxu0 }
 0x1ad   :  { %v793_v7 = vpop.f32.mrb[1].mxu0  ;;  %v1527_v59 = vmul.f32 0.00078125, %v2005_v0 }
 0x1ae   :  { %v1521_v58 = vpop.xlane.xlu0 %1520  ;;  %v1526_v51 = vmul.f32 0.00078125, %v793_v7 }
 0x1af   :  { %v1530_v60 = vmul.f32 0.8, %v1521_v58 }
 0x1b6   :  { %v1523_v49 = vpop.xlane.xlu1 %1522 }
 0x1b7   :  { %v1531_v15 = vmul.f32 0.8, %v1523_v49 }
 0x232   :  { %v2215_v13 = vpop.f32.mrb[0].mxu1 }
 0x233   :  { %2632 = vlog2.f32 %v2215_v13  ;;  %v1487_v16 = vpop.f32.mrb[1].mxu1 }
 0x234   :  { %2634 = vlog2.f32 %v1487_v16 }
 0x23d   :  { %v2633_v19 = vpop.eup %2632 }
 0x23e   :  { %v2635_v27 = vpop.eup %2634  ;;  %v1500_v43 = vmul.f32 0.6931472, %v2633_v19 }
 0x23f   :  { %v1498_v56 = vmul.f32 0.6931472, %v2635_v27 }
 0x240   :  { %v1502_v48 = vadd.f32 %v1500_v43, %v3029_v52 }
 0x241   :  { %v1501_v57 = vadd.f32 %v1498_v56, %v3023_v22 }
 0x242   :  { %v1525_v50 = vmul.f32 0.9, %v1502_v48 }
 0x243   :  { %v1524_v53 = vmul.f32 0.9, %v1501_v57 }
 0x244   :  { %v1529_v63 = vsub.f32 %v1525_v50, %v1527_v59 }
 0x245   :  { %v1528_v28 = vsub.f32 %v1524_v53, %v1526_v51 }
 0x246   :  { %v1533_v2 = vsub.f32 %v1529_v63, %v1531_v15 }
 0x247   :  { %v1532_v14 = vsub.f32 %v1528_v28, %v1530_v60 }
 0x248   :  { %v1537_v32 = vsel %vm1535_vm2, %v1533_v2, 0.0 }
 0x249   :  { %v1536_v33 = vsel %vm1535_vm2, %v1532_v14, 0.0 }
 0x24a   :  { %v1538_v62 = vadd.f32 %v1537_v32, %v1536_v33 }
 0x24c   :  { %v1539_v34 = vrot.slane %v1538_v62, 4 }
 0x24e   :  { %v1540_v20 = vadd.f32 %v1539_v34, %v1538_v62 }
 0x250   :  { %v1541_v21 = vrot.slane %v1540_v20, 2 }
 0x252   :  { %v1542_v35 = vadd.f32 %v1541_v21, %v1540_v20 }
 0x254   :  { %v1543_v23 = vrot.slane %v1542_v35, 1 }
 0x256   :  { %v1544_v38 = vadd.f32 %v1543_v23, %v1542_v35 }
 0x258   :  { %1547 = vperm.xlu0 %2627, %v1544_v38  }
 0x2d7   :  { %v1548_v39 = vpop.permute.xlu0 %1547 }
 0x2d8   :  { %1551 = vst [vmem:[#allocation5] sm:$0xff] %v1548_v39 }
 0x2d9   :  { %2669 = shalt.err (!%p2666_p12)
}
 0x2da   :  { %s2670_s14 = scalar_lea.hbm %s3199_s4, 128 }
 0x2db   :  { %p2671_p13 = scmp.ne.s32.totalorder %s3199_s4, %s2670_s14  ;;  %p2674_p0 = scmp.lt.u32.totalorder %s2670_s14, %s3199_s4 }
 0x2dd   :  { %p2676_p1 = pnand %p2674_p0, %p2671_p13 }
 0x2df   :  { %2679 = shalt.err (!%p2676_p1)
}
 0x2e0   :  { %1561 = dma.vmem_to_hbm [thread:$0]  %s1559_s10, 128, %s3199_s4, [#allocation4]  }
 0x2e1   :  { %2682 = dma.done.wait [#allocation4], 128  }
 0x2e2   :  { %2683 = vsyncadd [#allocation4], 4294967168 }
 0x2e3   :  { %1565 = vsyncpa [#allocation3], 1 }
 0x2e4   :  { %1566 = vsyncpa [#allocation4], 1 }

</bundles_post_ra>
